<compile_context>
chip_gen: v7x
topology: tpu7x:2x2x1
jax: 0.10.0
libtpu: 0.0.40
codegen_flags: <defaults>
</compile_context>

<pallas_src>
import functools

import jax
import jax.numpy as jnp
from jax.experimental import pallas as pl
from jax.experimental.pallas import tpu as pltpu

ACTION_SIZE = 22
HIDDEN_SIZE = 256
STATE_SIZE = 2 * 11 * 11 + 97           # = 339
IN_SIZE = STATE_SIZE + ACTION_SIZE      # = 361


def _round_up(x, m):
    return ((x + m - 1) // m) * m


def _qnet_kernel(s_ref, a_ref,
                 w1s_ref, w1a_ref, b1_ref,
                 w2_ref, b2_ref,
                 w3_ref, b3_ref,
                 w4_ref, b4_ref,
                 o_ref):
    """One batch tile of the fused MLP.

    relu(s@W1s + a@W1a + b1) -> relu(.@W2 + b2) -> relu(.@W3 + b3)
    -> sum(. * w4_row, -1) + b4
    """
    cdt = w2_ref.dtype  # MXU input (compute) dtype, e.g. bfloat16

    # In-kernel cast of the streamed activations (f32 in HBM -> bf16 on VPU).
    s = s_ref[...].astype(cdt)
    a = a_ref[...].astype(cdt)

    # Layer 1: split dot avoids materializing concat([state, action]) in HBM.
    h = (jnp.dot(s, w1s_ref[...], preferred_element_type=jnp.float32)
         + jnp.dot(a, w1a_ref[...], preferred_element_type=jnp.float32)
         + b1_ref[...])
    h = jnp.maximum(h, 0.0)

    h = jnp.dot(h.astype(cdt), w2_ref[...],
                preferred_element_type=jnp.float32) + b2_ref[...]
    h = jnp.maximum(h, 0.0)

    h = jnp.dot(h.astype(cdt), w3_ref[...],
                preferred_element_type=jnp.float32) + b3_ref[...]
    h = jnp.maximum(h, 0.0)

    # Final 256 -> 1 layer: weighted lane reduction (VPU/XLU), f32 throughout.
    o_ref[...] = jnp.sum(h * w4_ref[...], axis=-1, keepdims=True) + b4_ref[...]


@functools.partial(jax.jit, static_argnames=("batch_tile", "compute_dtype"))
def qnetwork_forward(state, action, params, *,
                     batch_tile=512, compute_dtype=jnp.bfloat16):
    """state: (B, STATE_SIZE) f32, action: (B, ACTION_SIZE) f32 -> (B, 1) f32."""
    B = state.shape[0]
    w1, b1, w2, b2, w3, b3, w4, b4 = params

    # Split W1 so the [state, action] concat never hits HBM; weights are cast
    # once in the wrapper (reused by every tile), activations are cast inside
    # the kernel.
    w1s = w1[:STATE_SIZE].astype(compute_dtype)
    w1a = w1[STATE_SIZE:].astype(compute_dtype)
    w2c = w2.astype(compute_dtype)
    w3c = w3.astype(compute_dtype)
    w4_row = w4.reshape(1, HIDDEN_SIZE).astype(jnp.float32)  # head stays f32 (VPU)
    b1f = b1.reshape(1, HIDDEN_SIZE).astype(jnp.float32)
    b2f = b2.reshape(1, HIDDEN_SIZE).astype(jnp.float32)
    b3f = b3.reshape(1, HIDDEN_SIZE).astype(jnp.float32)
    b4f = b4.reshape(1, 1).astype(jnp.float32)

    state_f = state.astype(jnp.float32)
    action_f = action.astype(jnp.float32)

    # Batch tile: at most `batch_tile` rows, sublane-aligned (multiple of 8).
    # 512 rows keeps everything (double-buffered tiles + resident weights +
    # f32 intermediates) well under the default scoped-VMEM limit while
    # amortizing the ~0.35us per-grid-step overhead.
    tb = min(batch_tile, _round_up(B, 8))
    num_blocks = pl.cdiv(B, tb)
    b_pad = num_blocks * tb
    if b_pad != B:
        state_f = jnp.pad(state_f, ((0, b_pad - B), (0, 0)))
        action_f = jnp.pad(action_f, ((0, b_pad - B), (0, 0)))

    def batch_spec(feat):
        # Tiled over the batch grid axis.
        return pl.BlockSpec((tb, feat), lambda i: (i, 0))

    def const_spec(arr):
        # Full-array block, constant index -> fetched once, stays VMEM-resident.
        return pl.BlockSpec(arr.shape, lambda i: (0,) * arr.ndim)

    in_specs = [
        batch_spec(STATE_SIZE),          # state tile   (f32, cast in-kernel)
        batch_spec(ACTION_SIZE),         # action tile  (f32, cast in-kernel)
        const_spec(w1s), const_spec(w1a), const_spec(b1f),
        const_spec(w2c), const_spec(b2f),
        const_spec(w3c), const_spec(b3f),
        const_spec(w4_row), const_spec(b4f),
    ]

    def _nbytes(a):
        return a.size * a.dtype.itemsize

    flops = 2 * b_pad * (STATE_SIZE * HIDDEN_SIZE + ACTION_SIZE * HIDDEN_SIZE
                         + 2 * HIDDEN_SIZE * HIDDEN_SIZE + HIDDEN_SIZE)
    bytes_accessed = (_nbytes(state_f) + _nbytes(action_f) + b_pad * 4
                      + _nbytes(w1s) + _nbytes(w1a) + _nbytes(w2c) + _nbytes(w3c)
                      + _nbytes(b1f) + _nbytes(b2f) + _nbytes(b3f)
                      + _nbytes(w4_row) + _nbytes(b4f))

    out = pl.pallas_call(
        _qnet_kernel,
        out_shape=jax.ShapeDtypeStruct((b_pad, 1), jnp.float32),
        grid=(num_blocks,),
        in_specs=in_specs,
        out_specs=pl.BlockSpec((tb, 1), lambda i: (i, 0)),
        compiler_params=pltpu.CompilerParams(
            # Batch tiles are independent -> shard across v7x's 2 TensorCores.
            dimension_semantics=("parallel",)),
        cost_estimate=pl.CostEstimate(flops=flops, transcendentals=0,
                                      bytes_accessed=bytes_accessed),
    )(state_f, action_f, w1s, w1a, b1f, w2c, b2f, w3c, b3f, w4_row, b4f)

    return out[:B]


def xavier_uniform(key, fan_in, fan_out, gain):
    bound = gain * jnp.sqrt(6.0 / (fan_in + fan_out))
    # Stored transposed relative to torch.nn.Linear.weight: (in, out).
    return jax.random.uniform(key, (fan_in, fan_out), jnp.float32, -bound, bound)


def init_params(key):
    relu_gain = jnp.sqrt(2.0)  # torch.nn.init.calculate_gain('relu')
    k1, k2, k3, k4 = jax.random.split(key, 4)
    w1 = xavier_uniform(k1, IN_SIZE, HIDDEN_SIZE, relu_gain)
    w2 = xavier_uniform(k2, HIDDEN_SIZE, HIDDEN_SIZE, relu_gain)
    w3 = xavier_uniform(k3, HIDDEN_SIZE, HIDDEN_SIZE, relu_gain)
    w4 = xavier_uniform(k4, HIDDEN_SIZE, 1, 1.0)
    b1 = jnp.zeros((1, HIDDEN_SIZE), jnp.float32)
    b2 = jnp.zeros((1, HIDDEN_SIZE), jnp.float32)
    b3 = jnp.zeros((1, HIDDEN_SIZE), jnp.float32)
    b4 = jnp.zeros((1, 1), jnp.float32)
    return (w1, b1, w2, b2, w3, b3, w4, b4)


if __name__ == "__main__":
    key = jax.random.PRNGKey(0)
    k_params, k_state, k_action = jax.random.split(key, 3)

    params = init_params(k_params)

    B = 8
    state = jax.random.normal(k_state, (B, STATE_SIZE), jnp.float32)
    action = jax.random.normal(k_action, (B, ACTION_SIZE), jnp.float32)

    out = qnetwork_forward(state, action, params)
    out = jax.block_until_ready(out)
    assert out.shape == (B, 1)

    # Pure-JAX reference with matching bf16-on-MXU / f32-accumulate numerics.
    w1, b1, w2, b2, w3, b3, w4, b4 = params
    cdt = jnp.bfloat16
    x = jnp.concatenate([state, action], axis=1).astype(cdt)
    h = jnp.maximum(jnp.dot(x, w1.astype(cdt),
                            preferred_element_type=jnp.float32) + b1, 0.0)
    h = jnp.maximum(jnp.dot(h.astype(cdt), w2.astype(cdt),
                            preferred_element_type=jnp.float32) + b2, 0.0)
    h = jnp.maximum(jnp.dot(h.astype(cdt), w3.astype(cdt),
                            preferred_element_type=jnp.float32) + b3, 0.0)
    ref = jnp.sum(h * w4.reshape(1, HIDDEN_SIZE), axis=-1, keepdims=True) + b4.reshape(1, 1)

    max_err = float(jnp.max(jnp.abs(out - ref)))
    assert jnp.allclose(out, ref, atol=2e-2, rtol=2e-2), max_err

    print("KERNEL_OK")
</pallas_src>

<mosaic_0001>
module attributes {stable_mosaic.version = 11 : i64} {
  func.func @_qnet_kernel(%arg0: i32, %arg1: memref<8x339xf32, #tpu.memory_space<vmem>>, %arg2: memref<8x22xf32, #tpu.memory_space<vmem>>, %arg3: memref<339x256xbf16, #tpu.memory_space<vmem>>, %arg4: memref<22x256xbf16, #tpu.memory_space<vmem>>, %arg5: memref<1x256xf32, #tpu.memory_space<vmem>>, %arg6: memref<256x256xbf16, #tpu.memory_space<vmem>>, %arg7: memref<1x256xf32, #tpu.memory_space<vmem>>, %arg8: memref<256x256xbf16, #tpu.memory_space<vmem>>, %arg9: memref<1x256xf32, #tpu.memory_space<vmem>>, %arg10: memref<1x256xf32, #tpu.memory_space<vmem>>, %arg11: memref<1x1xf32, #tpu.memory_space<vmem>>, %arg12: memref<8x1xf32, #tpu.memory_space<vmem>>) attributes {dimension_semantics = [#tpu.dimension_semantics<parallel>], iteration_bounds = array<i64: 1>, scalar_prefetch = 0 : i64, scratch_operands = 0 : i64, tpu.core_type = #tpu.core_type<tc>, window_params = [{transform_indices = @transform_0, window_bounds = array<i64: 8, 339>}, {transform_indices = @transform_1, window_bounds = array<i64: 8, 22>}, {pipeline_mode = #tpu.pipeline_mode<synchronous>, transform_indices = @transform_2, window_bounds = array<i64: 339, 256>}, {pipeline_mode = #tpu.pipeline_mode<synchronous>, transform_indices = @transform_3, window_bounds = array<i64: 22, 256>}, {pipeline_mode = #tpu.pipeline_mode<synchronous>, transform_indices = @transform_4, window_bounds = array<i64: 1, 256>}, {pipeline_mode = #tpu.pipeline_mode<synchronous>, transform_indices = @transform_5, window_bounds = array<i64: 256, 256>}, {pipeline_mode = #tpu.pipeline_mode<synchronous>, transform_indices = @transform_6, window_bounds = array<i64: 1, 256>}, {pipeline_mode = #tpu.pipeline_mode<synchronous>, transform_indices = @transform_7, window_bounds = array<i64: 256, 256>}, {pipeline_mode = #tpu.pipeline_mode<synchronous>, transform_indices = @transform_8, window_bounds = array<i64: 1, 256>}, {pipeline_mode = #tpu.pipeline_mode<synchronous>, transform_indices = @transform_9, window_bounds = array<i64: 1, 256>}, {pipeline_mode = #tpu.pipeline_mode<synchronous>, transform_indices = @transform_10, window_bounds = array<i64: 1, 1>}, {transform_indices = @transform_11, window_bounds = array<i64: 8, 1>}]} {
    %c0 = arith.constant 0 : index
    %c0_0 = arith.constant 0 : index
    %0 = vector.load %arg1[%c0, %c0_0] : memref<8x339xf32, #tpu.memory_space<vmem>>, vector<8x339xf32>
    %1 = arith.truncf %0 : vector<8x339xf32> to vector<8x339xbf16>
    %c0_1 = arith.constant 0 : index
    %c0_2 = arith.constant 0 : index
    %2 = vector.load %arg2[%c0_1, %c0_2] : memref<8x22xf32, #tpu.memory_space<vmem>>, vector<8x22xf32>
    %3 = arith.truncf %2 : vector<8x22xf32> to vector<8x22xbf16>
    %c0_3 = arith.constant 0 : index
    %c0_4 = arith.constant 0 : index
    %4 = vector.load %arg3[%c0_3, %c0_4] : memref<339x256xbf16, #tpu.memory_space<vmem>>, vector<339x256xbf16>
    %cst = arith.constant dense<0.000000e+00> : vector<8x256xf32>
    %5 = tpu.matmul %1, %4, %cst {dimension_numbers = #tpu.dot_dimension_numbers<[1], [0], [0], [1], [0, 0, 1, 1], [], []>} : vector<8x339xbf16>, vector<339x256xbf16>, vector<8x256xf32> -> vector<8x256xf32>
    %c0_5 = arith.constant 0 : index
    %c0_6 = arith.constant 0 : index
    %6 = vector.load %arg4[%c0_5, %c0_6] : memref<22x256xbf16, #tpu.memory_space<vmem>>, vector<22x256xbf16>
    %cst_7 = arith.constant dense<0.000000e+00> : vector<8x256xf32>
    %7 = tpu.matmul %3, %6, %cst_7 {dimension_numbers = #tpu.dot_dimension_numbers<[1], [0], [0], [1], [0, 0, 1, 1], [], []>} : vector<8x22xbf16>, vector<22x256xbf16>, vector<8x256xf32> -> vector<8x256xf32>
    %8 = arith.addf %5, %7 : vector<8x256xf32>
    %c0_8 = arith.constant 0 : index
    %c0_9 = arith.constant 0 : index
    %9 = vector.load %arg5[%c0_8, %c0_9] : memref<1x256xf32, #tpu.memory_space<vmem>>, vector<1x256xf32>
    %10 = vector.broadcast %9 : vector<1x256xf32> to vector<8x256xf32>
    %11 = arith.addf %8, %10 : vector<8x256xf32>
    %cst_10 = arith.constant 0.000000e+00 : f32
    %12 = vector.broadcast %cst_10 : f32 to vector<8x256xf32>
    %13 = arith.maximumf %11, %12 : vector<8x256xf32>
    %14 = arith.truncf %13 : vector<8x256xf32> to vector<8x256xbf16>
    %c0_11 = arith.constant 0 : index
    %c0_12 = arith.constant 0 : index
    %15 = vector.load %arg6[%c0_11, %c0_12] : memref<256x256xbf16, #tpu.memory_space<vmem>>, vector<256x256xbf16>
    %cst_13 = arith.constant dense<0.000000e+00> : vector<8x256xf32>
    %16 = tpu.matmul %14, %15, %cst_13 {dimension_numbers = #tpu.dot_dimension_numbers<[1], [0], [0], [1], [0, 0, 1, 1], [], []>} : vector<8x256xbf16>, vector<256x256xbf16>, vector<8x256xf32> -> vector<8x256xf32>
    %c0_14 = arith.constant 0 : index
    %c0_15 = arith.constant 0 : index
    %17 = vector.load %arg7[%c0_14, %c0_15] : memref<1x256xf32, #tpu.memory_space<vmem>>, vector<1x256xf32>
    %18 = vector.broadcast %17 : vector<1x256xf32> to vector<8x256xf32>
    %19 = arith.addf %16, %18 : vector<8x256xf32>
    %cst_16 = arith.constant 0.000000e+00 : f32
    %20 = vector.broadcast %cst_16 : f32 to vector<8x256xf32>
    %21 = arith.maximumf %19, %20 : vector<8x256xf32>
    %22 = arith.truncf %21 : vector<8x256xf32> to vector<8x256xbf16>
    %c0_17 = arith.constant 0 : index
    %c0_18 = arith.constant 0 : index
    %23 = vector.load %arg8[%c0_17, %c0_18] : memref<256x256xbf16, #tpu.memory_space<vmem>>, vector<256x256xbf16>
    %cst_19 = arith.constant dense<0.000000e+00> : vector<8x256xf32>
    %24 = tpu.matmul %22, %23, %cst_19 {dimension_numbers = #tpu.dot_dimension_numbers<[1], [0], [0], [1], [0, 0, 1, 1], [], []>} : vector<8x256xbf16>, vector<256x256xbf16>, vector<8x256xf32> -> vector<8x256xf32>
    %c0_20 = arith.constant 0 : index
    %c0_21 = arith.constant 0 : index
    %25 = vector.load %arg9[%c0_20, %c0_21] : memref<1x256xf32, #tpu.memory_space<vmem>>, vector<1x256xf32>
    %26 = vector.broadcast %25 : vector<1x256xf32> to vector<8x256xf32>
    %27 = arith.addf %24, %26 : vector<8x256xf32>
    %cst_22 = arith.constant 0.000000e+00 : f32
    %28 = vector.broadcast %cst_22 : f32 to vector<8x256xf32>
    %29 = arith.maximumf %27, %28 : vector<8x256xf32>
    %c0_23 = arith.constant 0 : index
    %c0_24 = arith.constant 0 : index
    %30 = vector.load %arg10[%c0_23, %c0_24] : memref<1x256xf32, #tpu.memory_space<vmem>>, vector<1x256xf32>
    %31 = vector.broadcast %30 : vector<1x256xf32> to vector<8x256xf32>
    %32 = arith.mulf %29, %31 : vector<8x256xf32>
    %cst_25 = arith.constant dense<0.000000e+00> : vector<8xf32>
    %33 = vector.multi_reduction <add>, %32, %cst_25 [1] : vector<8x256xf32> to vector<8xf32>
    %34 = vector.shape_cast %33 : vector<8xf32> to vector<8x1xf32>
    %c0_26 = arith.constant 0 : index
    %c0_27 = arith.constant 0 : index
    %35 = vector.load %arg11[%c0_26, %c0_27] : memref<1x1xf32, #tpu.memory_space<vmem>>, vector<1x1xf32>
    %36 = vector.broadcast %35 : vector<1x1xf32> to vector<8x1xf32>
    %37 = arith.addf %34, %36 : vector<8x1xf32>
    %c0_28 = arith.constant 0 : index
    %c0_29 = arith.constant 0 : index
    %38 = vector.load %arg12[%c0_28, %c0_29] : memref<8x1xf32, #tpu.memory_space<vmem>>, vector<8x1xf32>
    tpu.vector_store %arg12[%c0_28, %c0_29], %37 {strides = array<i32>} : memref<8x1xf32, #tpu.memory_space<vmem>>, vector<8x1xf32>,
    return
  }
  func.func @transform_0(%arg0: i32) -> (i32, i32) {
    %c0_i32 = arith.constant 0 : i32
    %c0_i32_0 = arith.constant 0 : i32
    return %arg0, %c0_i32 : i32, i32
  }
  func.func @transform_1(%arg0: i32) -> (i32, i32) {
    %c0_i32 = arith.constant 0 : i32
    %c0_i32_0 = arith.constant 0 : i32
    return %arg0, %c0_i32 : i32, i32
  }
  func.func @transform_2(%arg0: i32) -> (i32, i32) {
    %c0_i32 = arith.constant 0 : i32
    %c0_i32_0 = arith.constant 0 : i32
    %c0_i32_1 = arith.constant 0 : i32
    return %c0_i32, %c0_i32_0 : i32, i32
  }
  func.func @transform_3(%arg0: i32) -> (i32, i32) {
    %c0_i32 = arith.constant 0 : i32
    %c0_i32_0 = arith.constant 0 : i32
    %c0_i32_1 = arith.constant 0 : i32
    return %c0_i32, %c0_i32_0 : i32, i32
  }
  func.func @transform_4(%arg0: i32) -> (i32, i32) {
    %c0_i32 = arith.constant 0 : i32
    %c0_i32_0 = arith.constant 0 : i32
    %c0_i32_1 = arith.constant 0 : i32
    return %c0_i32, %c0_i32_0 : i32, i32
  }
  func.func @transform_5(%arg0: i32) -> (i32, i32) {
    %c0_i32 = arith.constant 0 : i32
    %c0_i32_0 = arith.constant 0 : i32
    %c0_i32_1 = arith.constant 0 : i32
    return %c0_i32, %c0_i32_0 : i32, i32
  }
  func.func @transform_6(%arg0: i32) -> (i32, i32) {
    %c0_i32 = arith.constant 0 : i32
    %c0_i32_0 = arith.constant 0 : i32
    %c0_i32_1 = arith.constant 0 : i32
    return %c0_i32, %c0_i32_0 : i32, i32
  }
  func.func @transform_7(%arg0: i32) -> (i32, i32) {
    %c0_i32 = arith.constant 0 : i32
    %c0_i32_0 = arith.constant 0 : i32
    %c0_i32_1 = arith.constant 0 : i32
    return %c0_i32, %c0_i32_0 : i32, i32
  }
  func.func @transform_8(%arg0: i32) -> (i32, i32) {
    %c0_i32 = arith.constant 0 : i32
    %c0_i32_0 = arith.constant 0 : i32
    %c0_i32_1 = arith.constant 0 : i32
    return %c0_i32, %c0_i32_0 : i32, i32
  }
  func.func @transform_9(%arg0: i32) -> (i32, i32) {
    %c0_i32 = arith.constant 0 : i32
    %c0_i32_0 = arith.constant 0 : i32
    %c0_i32_1 = arith.constant 0 : i32
    return %c0_i32, %c0_i32_0 : i32, i32
  }
  func.func @transform_10(%arg0: i32) -> (i32, i32) {
    %c0_i32 = arith.constant 0 : i32
    %c0_i32_0 = arith.constant 0 : i32
    %c0_i32_1 = arith.constant 0 : i32
    return %c0_i32, %c0_i32_0 : i32, i32
  }
  func.func @transform_11(%arg0: i32) -> (i32, i32) {
    %c0_i32 = arith.constant 0 : i32
    %c0_i32_0 = arith.constant 0 : i32
    return %arg0, %c0_i32 : i32, i32
  }
}

</mosaic_0001>

<bundles_post_ra>
// kernel: qnetwork_forward.1
= control target key start
LH: loop header
LB: loop body
LE: loop exit
PB: predicated region body
PF: predicated region fallthrough
CT: control target
= control target key end

     0   :  { %v1302_v1 = vmov 0   ;;  %vm114_vm0 = vcmask 1042432   ;;  %vm110_vm1 = vcmask 179200   ;;  %vm381_vm2 = vcmask 1040384   ;;  %s1736_s2 = inlined_call_operand.vmem [shape: bf16[339,256], index: 2, kind: input, shape index: {}]   ;;  %s1737_s3 = inlined_call_operand.vmem [shape: bf16[22,256], index: 3, kind: input, shape index: {}]   ;;  %s1738_s1 = inlined_call_operand.vmem [shape: f32[8,22], index: 1, kind: input, shape index: {}]   ;;  %s1739_s0 = inlined_call_operand.vmem [shape: f32[8,339], index: 0, kind: input, shape index: {}]   ;;  %s1740_s5 = inlined_call_operand.vmem [shape: bf16[256,256], index: 5, kind: input, shape index: {}]   ;;  %s1741_s7 = inlined_call_operand.vmem [shape: bf16[256,256], index: 7, kind: input, shape index: {}]   ;;  %s1742_s4 = inlined_call_operand.vmem [shape: f32[1,256], index: 4, kind: input, shape index: {}]   ;;  %s1743_s6 = inlined_call_operand.vmem [shape: f32[1,256], index: 6, kind: input, shape index: {}]   ;;  %s1744_s10 = inlined_call_operand.<no memory space> [shape: f32[1,1], index: 10, kind: input, shape index: {}]   ;;  %s1745_s8 = inlined_call_operand.vmem [shape: f32[1,256], index: 8, kind: input, shape index: {}]   ;;  %s1746_s9 = inlined_call_operand.vmem [shape: f32[1,256], index: 9, kind: input, shape index: {}]   ;;  %s1747_s11 = inlined_call_operand.vmem [shape: f32[8,1], index: 11, kind: output, shape index: {}]  }
   0x1   :  { %v1136_v0 = vld [vmem:[%s1736_s2 + $0x4] ss:$8 sps:$4 sm:$0xff]   ;;  %153 = vmatprep.mubr.bf16.mxu0 %v1302_v1  ;;  %v1138_v2 = vld [vmem:[%s1736_s2] ss:$8 sps:$4 sm:$0xff]   ;;  %v1139_v3 = vld [vmem:[%s1736_s2 + $0x14] ss:$8 sps:$4 sm:$0xff]  }
   0x2   :  { %391 = vmatprep.subr.bf16.mxu1 %v1136_v0  ;;  %v1141_v4 = vld [vmem:[%s1736_s2 + $0x10] ss:$8 sps:$4 sm:$0xff]   ;;  %v1142_v5 = vld [vmem:[%s1736_s2 + $0x24] ss:$8 sps:$4 sm:$0xff]   ;;  %v1144_v6 = vld [vmem:[%s1736_s2 + $0x20] ss:$8 sps:$4 sm:$0xff]  }
   0x3   :  { %392 = vmatpush1.bf16.msra.mxu1 %v1138_v2  ;;  %v1145_v7 = vld [vmem:[%s1736_s2 + $0x34] ss:$8 sps:$4 sm:$0xff]   ;;  %v1147_v8 = vld [vmem:[%s1736_s2 + $0x30] ss:$8 sps:$4 sm:$0xff]   ;;  %v1148_v9 = vld [vmem:[%s1736_s2 + $0x44] ss:$8 sps:$4 sm:$0xff]  }
   0x4   :  { %393 = vmatprep.subr.bf16.mxu1 %v1139_v3  ;;  %v94_v10 = vld [vmem:[%s1737_s3 + $0x10] sm:$0x77]  ;;  %v1160_v11 = vld [vmem:[%s1737_s3 + $0x4] ss:$8 sps:$4 sm:$0xff]   ;;  %v1163_v13 = vld [vmem:[%s1737_s3] ss:$8 sps:$4 sm:$0xff]  }
   0x5   :  { %v1021_v12 = vcombine.high %v94_v10, %v94_v10  ;;  %v1020_v14 = vcombine.low %v94_v10, %v94_v10  ;;  %121 = vmatprep.subr.bf16.mxu0 %v1160_v11  ;;  %v1150_v15 = vld [vmem:[%s1736_s2 + $0x40] ss:$8 sps:$4 sm:$0xff]   ;;  %v1151_v16 = vld [vmem:[%s1736_s2 + $0x54] ss:$8 sps:$4 sm:$0xff]   ;;  %v1173_v18 = vld [vmem:[%s1736_s2 + $0x104] ss:$8 sps:$4 sm:$0xff]  }
   0x6   :  { %122 = vmatpush1.bf16.msra.mxu0 %v1163_v13  ;;  %v47_v19 = vld [vmem:[%s1738_s1] sm:$0xff]  ;;  %v1153_v20 = vld [vmem:[%s1736_s2 + $0x50] ss:$8 sps:$4 sm:$0xff]   ;;  %v1179_v23 = vld [vmem:[%s1736_s2 + $0x114] ss:$8 sps:$4 sm:$0xff]   ;;  %vm382_vm3 = vcmask 1041408  }
   0x7   :  { %394 = vmatpush1.bf16.msra.mxu1 %v1141_v4  ;;  %1022 = vmatprep.subr.msk.bf16.mxu0 %vm114_vm0, %v1021_v12  ;;  %v116_v17 = vsel %vm114_vm0, %v1020_v14, 0  ;;  %v48_v21 = vpack.c.bf16 %v47_v19, %v47_v19  ;;  %v1171_v22 = vld [vmem:[%s1736_s2 + $0x100] ss:$8 sps:$4 sm:$0xff]   ;;  %v1154_v24 = vld [vmem:[%s1736_s2 + $0x64] ss:$8 sps:$4 sm:$0xff]   ;;  %v1303_v34 = vmov 65535  }
   0x8   :  { %395 = vmatprep.subr.bf16.mxu1 %v1142_v5  ;;  %v1156_v25 = vld [vmem:[%s1736_s2 + $0x60] ss:$8 sps:$4 sm:$0xff]   ;;  %v1177_v26 = vld [vmem:[%s1736_s2 + $0x110] ss:$8 sps:$4 sm:$0xff]   ;;  %v1185_v27 = vld [vmem:[%s1736_s2 + $0x124] ss:$8 sps:$4 sm:$0xff]  }
   0x9   :  { %v1157_v28 = vld [vmem:[%s1736_s2 + $0x74] ss:$8 sps:$4 sm:$0xff]   ;;  %v1159_v29 = vld [vmem:[%s1736_s2 + $0x70] ss:$8 sps:$4 sm:$0xff]   ;;  %v1183_v30 = vld [vmem:[%s1736_s2 + $0x120] ss:$8 sps:$4 sm:$0xff]  }
   0xa   :  { %124 = vmatpush1.bf16.msra.mxu0 %v116_v17  ;;  %v1191_v31 = vld [vmem:[%s1736_s2 + $0x134] ss:$8 sps:$4 sm:$0xff]   ;;  %v1164_v32 = vld [vmem:[%s1736_s2 + $0x84] ss:$8 sps:$4 sm:$0xff]   ;;  %v383_v35 = vsel %vm381_vm2, 4294967295, %v1303_v34  ;;  %vm377_vm4 = vcmask 678912  }
   0xb   :  { %396 = vmatpush1.bf16.msra.mxu1 %v1144_v6  ;;  %432 = vmatprep.subr.bf16.mxu0 %v1173_v18  ;;  %v91_v33 = vld [vmem:[%s1736_s2 + $0x150] sm:$0x33]  ;;  %v1166_v36 = vld [vmem:[%s1736_s2 + $0x80] ss:$8 sps:$4 sm:$0xff]   ;;  %v1197_v39 = vld [vmem:[%s1736_s2 + $0x144] ss:$8 sps:$4 sm:$0xff]  }
   0xc   :  { %397 = vmatprep.subr.bf16.mxu1 %v1145_v7  ;;  %v1189_v37 = vld [vmem:[%s1736_s2 + $0x130] ss:$8 sps:$4 sm:$0xff]   ;;  %v42_v38 = vld [vmem:[%s1739_s0 + $0x8] sm:$0xff]  ;;  %v1067_v40 = vcombine.high %v91_v33, %v91_v33  ;;  %v1168_v42 = vld [vmem:[%s1736_s2 + $0x94] ss:$8 sps:$4 sm:$0xff]   ;;  %v384_v43 = vsel %vm382_vm3, %v383_v35, 0  ;;  %v1066_v45 = vcombine.low %v91_v33, %v91_v33 }
   0xd   :  { %1023 = vmatmul.mubr.msk.bf16.vlgmr.msra.gmra.mrb[0].mxu0 %vm110_vm1, %v48_v21  ;;  %v45_v41 = vpack.c.bf16 %v42_v38, %v42_v38  ;;  %v1195_v44 = vld [vmem:[%s1736_s2 + $0x140] ss:$8 sps:$4 sm:$0xff]   ;;  %v1170_v46 = vld [vmem:[%s1736_s2 + $0x90] ss:$8 sps:$4 sm:$0xff]   ;;  %v1174_v48 = vld [vmem:[%s1736_s2 + $0xa4] ss:$8 sps:$4 sm:$0xff]  }
   0xe   :  { %433 = vmatpush1.bf16.msra.mxu0 %v1171_v22  ;;  %464 = vmatprep.mubr.bf16.mxu0 %v1302_v1  ;;  %v389_v47 = vand.u32 %v1067_v40, %v384_v43  ;;  %v1176_v49 = vld [vmem:[%s1736_s2 + $0xa0] ss:$8 sps:$4 sm:$0xff]   ;;  %v386_v50 = vand.u32 %v1066_v45, %v384_v43  ;;  %v43_v51 = vld [vmem:[%s1739_s0 + $0x10] sm:$0xff]  ;;  %v1208_v52 = vld [vmem:[%s1740_s5 + $0x4] ss:$8 sps:$4 sm:$0xff]   ;;  %vm1012_vm5 = vcmask 7168  }
   0xf   :  { %398 = vmatpush1.bf16.msra.mxu1 %v1147_v8  ;;  %434 = vmatprep.subr.bf16.mxu0 %v1179_v23  ;;  %v1180_v53 = vld [vmem:[%s1736_s2 + $0xb4] ss:$8 sps:$4 sm:$0xff]   ;;  %v1206_v54 = vld [vmem:[%s1740_s5] ss:$8 sps:$4 sm:$0xff]   ;;  %v1182_v55 = vld [vmem:[%s1736_s2 + $0xb0] ss:$8 sps:$4 sm:$0xff]   ;;  %v46_v56 = vpack.c.bf16 %v43_v51, %v43_v51 }
  0x10   :  { %399 = vmatprep.subr.bf16.mxu1 %v1148_v9  ;;  %423 = vmatprep.mubr.bf16.mxu1 %v45_v41  ;;  %v1211_v57 = vld [vmem:[%s1740_s5 + $0x14] ss:$8 sps:$4 sm:$0xff]   ;;  %v1186_v58 = vld [vmem:[%s1736_s2 + $0xc4] ss:$8 sps:$4 sm:$0xff]   ;;  %v1209_v59 = vld [vmem:[%s1740_s5 + $0x10] ss:$8 sps:$4 sm:$0xff]  }
  0x11   :  { %v1188_v60 = vld [vmem:[%s1736_s2 + $0xc0] ss:$8 sps:$4 sm:$0xff]   ;;  %v1214_v61 = vld [vmem:[%s1740_s5 + $0x24] ss:$8 sps:$4 sm:$0xff]   ;;  %v1192_v62 = vld [vmem:[%s1736_s2 + $0xd4] ss:$8 sps:$4 sm:$0xff]  }
  0x12   :  { %435 = vmatpush1.bf16.msra.mxu0 %v1177_v26  ;;  %v1212_v63 = vld [vmem:[%s1740_s5 + $0x20] ss:$8 sps:$4 sm:$0xff]   ;;  %v1194_v0 = vld [vmem:[%s1736_s2 + $0xd0] ss:$8 sps:$4 sm:$0xff]   ;;  %v1217_v1 = vld [vmem:[%s1740_s5 + $0x34] ss:$8 sps:$4 sm:$0xff]  }
  0x13   :  { %400 = vmatpush1.bf16.msra.mxu1 %v1150_v15  ;;  %436 = vmatprep.subr.bf16.mxu0 %v1185_v27  ;;  %v1198_v2 = vld [vmem:[%s1736_s2 + $0xe4] ss:$8 sps:$4 sm:$0xff]   ;;  %v1215_v3 = vld [vmem:[%s1740_s5 + $0x30] ss:$8 sps:$4 sm:$0xff]   ;;  %v1200_v4 = vld [vmem:[%s1736_s2 + $0xe0] ss:$8 sps:$4 sm:$0xff]  }
  0x14   :  { %401 = vmatprep.subr.bf16.mxu1 %v1151_v16  ;;  %v1220_v5 = vld [vmem:[%s1740_s5 + $0x44] ss:$8 sps:$4 sm:$0xff]   ;;  %v1203_v6 = vld [vmem:[%s1736_s2 + $0xf4] ss:$8 sps:$4 sm:$0xff]   ;;  %v1218_v7 = vld [vmem:[%s1740_s5 + $0x40] ss:$8 sps:$4 sm:$0xff]  }
  0x15   :  { %v1205_v8 = vld [vmem:[%s1736_s2 + $0xf0] ss:$8 sps:$4 sm:$0xff]   ;;  %v41_v9 = vld [vmem:[%s1739_s0] sm:$0xff]  ;;  %v1223_v10 = vld [vmem:[%s1740_s5 + $0x54] ss:$8 sps:$4 sm:$0xff]  }
  0x16   :  { %437 = vmatpush1.bf16.msra.mxu0 %v1183_v30  ;;  %v44_v11 = vpack.c.bf16 %v41_v9, %v41_v9  ;;  %v1221_v12 = vld [vmem:[%s1740_s5 + $0x50] ss:$8 sps:$4 sm:$0xff]   ;;  %v1226_v13 = vld [vmem:[%s1740_s5 + $0x64] ss:$8 sps:$4 sm:$0xff]   ;;  %v1224_v14 = vld [vmem:[%s1740_s5 + $0x60] ss:$8 sps:$4 sm:$0xff]  }
  0x17   :  { %402 = vmatpush1.bf16.msra.mxu1 %v1153_v20  ;;  %438 = vmatprep.subr.bf16.mxu0 %v1191_v31  ;;  %v1227_v15 = vld [vmem:[%s1740_s5 + $0x70] ss:$8 sps:$4 sm:$0xff]   ;;  %v1229_v16 = vld [vmem:[%s1740_s5 + $0x74] ss:$8 sps:$4 sm:$0xff]   ;;  %v1232_v17 = vld [vmem:[%s1740_s5 + $0x84] ss:$8 sps:$4 sm:$0xff]  }
  0x18   :  { %403 = vmatprep.subr.bf16.mxu1 %v1154_v24  ;;  %v1230_v18 = vld [vmem:[%s1740_s5 + $0x80] ss:$8 sps:$4 sm:$0xff]   ;;  %v1235_v19 = vld [vmem:[%s1740_s5 + $0x94] ss:$8 sps:$4 sm:$0xff]   ;;  %v1233_v20 = vld [vmem:[%s1740_s5 + $0x90] ss:$8 sps:$4 sm:$0xff]  }
  0x19   :  { %v1238_v21 = vld [vmem:[%s1740_s5 + $0xa4] ss:$8 sps:$4 sm:$0xff]   ;;  %v1236_v22 = vld [vmem:[%s1740_s5 + $0xa0] ss:$8 sps:$4 sm:$0xff]   ;;  %v1241_v23 = vld [vmem:[%s1740_s5 + $0xb4] ss:$8 sps:$4 sm:$0xff]  }
  0x1a   :  { %439 = vmatpush1.bf16.msra.mxu0 %v1189_v37  ;;  %v1239_v24 = vld [vmem:[%s1740_s5 + $0xb0] ss:$8 sps:$4 sm:$0xff]   ;;  %v1242_v26 = vld [vmem:[%s1740_s5 + $0xc0] ss:$8 sps:$4 sm:$0xff]   ;;  %v1247_v27 = vld [vmem:[%s1740_s5 + $0xd4] ss:$8 sps:$4 sm:$0xff]  }
  0x1b   :  { %404 = vmatpush1.bf16.msra.mxu1 %v1156_v25  ;;  %440 = vmatprep.subr.bf16.mxu0 %v1197_v39  ;;  %v1244_v25 = vld [vmem:[%s1740_s5 + $0xc4] ss:$8 sps:$4 sm:$0xff]   ;;  %v1248_v30 = vld [vmem:[%s1740_s5 + $0xe0] ss:$8 sps:$4 sm:$0xff]   ;;  %v1253_v31 = vld [vmem:[%s1740_s5 + $0xf4] ss:$8 sps:$4 sm:$0xff]  }
  0x1c   :  { %405 = vmatprep.subr.bf16.mxu1 %v1157_v28  ;;  %v1245_v28 = vld [vmem:[%s1740_s5 + $0xd0] ss:$8 sps:$4 sm:$0xff]   ;;  %v1254_v33 = vld [vmem:[%s1741_s7] ss:$8 sps:$4 sm:$0xff]   ;;  %v1256_v34 = vld [vmem:[%s1741_s7 + $0x4] ss:$8 sps:$4 sm:$0xff]  }
  0x1d   :  { %v1259_v35 = vld [vmem:[%s1741_s7 + $0x14] ss:$8 sps:$4 sm:$0xff]   ;;  %v1262_v37 = vld [vmem:[%s1741_s7 + $0x24] ss:$8 sps:$4 sm:$0xff]   ;;  %v1260_v38 = vld [vmem:[%s1741_s7 + $0x20] ss:$8 sps:$4 sm:$0xff]  }
  0x1e   :  { %441 = vmatpush1.bf16.msra.mxu0 %v1195_v44  ;;  %v1265_v39 = vld [vmem:[%s1741_s7 + $0x34] ss:$8 sps:$4 sm:$0xff]   ;;  %v1263_v40 = vld [vmem:[%s1741_s7 + $0x30] ss:$8 sps:$4 sm:$0xff]   ;;  %v1268_v41 = vld [vmem:[%s1741_s7 + $0x44] ss:$8 sps:$4 sm:$0xff]  }
  0x1f   :  { %406 = vmatpush1.bf16.msra.mxu1 %v1159_v29  ;;  %442 = vmatprep.subr.bf16.mxu0 %v389_v47  ;;  %v1250_v29 = vld [vmem:[%s1740_s5 + $0xe4] ss:$8 sps:$4 sm:$0xff]   ;;  %v1271_v43 = vld [vmem:[%s1741_s7 + $0x54] ss:$8 sps:$4 sm:$0xff]   ;;  %v1269_v44 = vld [vmem:[%s1741_s7 + $0x50] ss:$8 sps:$4 sm:$0xff]  }
  0x20   :  { %407 = vmatprep.subr.bf16.mxu1 %v1164_v32  ;;  %v1251_v32 = vld [vmem:[%s1740_s5 + $0xf0] ss:$8 sps:$4 sm:$0xff]   ;;  %v1274_v45 = vld [vmem:[%s1741_s7 + $0x64] ss:$8 sps:$4 sm:$0xff]   ;;  %v1277_v47 = vld [vmem:[%s1741_s7 + $0x74] ss:$8 sps:$4 sm:$0xff]  }
  0x21   :  { %v1283_v51 = vld [vmem:[%s1741_s7 + $0x94] ss:$8 sps:$4 sm:$0xff]  }
  0x22   :  { %443 = vmatpush1.bf16.msra.mxu0 %v386_v50  ;;  %v1278_v50 = vld [vmem:[%s1741_s7 + $0x80] ss:$8 sps:$4 sm:$0xff]  }
  0x23   :  { %408 = vmatpush1.bf16.msra.mxu1 %v1166_v36  ;;  %695 = vmatprep.subr.bf16.mxu0 %v1208_v52  ;;  %v1257_v36 = vld [vmem:[%s1741_s7 + $0x10] ss:$8 sps:$4 sm:$0xff]  }
  0x24   :  { %409 = vmatprep.subr.bf16.mxu1 %v1168_v42  ;;  %v1266_v42 = vld [vmem:[%s1741_s7 + $0x40] ss:$8 sps:$4 sm:$0xff]   ;;  %v1281_v52 = vld [vmem:[%s1741_s7 + $0x90] ss:$8 sps:$4 sm:$0xff]  }
  0x25   :  { %1068 = vmatmul.mubr.msk.bf16.vlgmr.msra.gmra.mrb[4].mxu0 %vm377_vm4, %v46_v56  ;;  %v1287_v56 = vld [vmem:[%s1741_s7 + $0xb0] ss:$8 sps:$4 sm:$0xff]  }
  0x26   :  { %696 = vmatpush1.bf16.msra.mxu0 %v1206_v54  ;;  %v1284_v54 = vld [vmem:[%s1741_s7 + $0xa0] ss:$8 sps:$4 sm:$0xff]  }
  0x27   :  { %410 = vmatpush1.bf16.msra.mxu1 %v1170_v46  ;;  %697 = vmatprep.subr.bf16.mxu0 %v1211_v57  ;;  %v1272_v46 = vld [vmem:[%s1741_s7 + $0x60] ss:$8 sps:$4 sm:$0xff]   ;;  %v1292_v57 = vld [vmem:[%s1741_s7 + $0xc4] ss:$8 sps:$4 sm:$0xff]  }
  0x28   :  { %411 = vmatprep.subr.bf16.mxu1 %v1174_v48  ;;  %v1275_v48 = vld [vmem:[%s1741_s7 + $0x70] ss:$8 sps:$4 sm:$0xff]  }
  0x2a   :  { %698 = vmatpush1.bf16.msra.mxu0 %v1209_v59  ;;  %v1295_v59 = vld [vmem:[%s1741_s7 + $0xd4] ss:$8 sps:$4 sm:$0xff]  }
  0x2b   :  { %412 = vmatpush1.bf16.msra.mxu1 %v1176_v49  ;;  %699 = vmatprep.subr.bf16.mxu0 %v1214_v61  ;;  %v1280_v49 = vld [vmem:[%s1741_s7 + $0x84] ss:$8 sps:$4 sm:$0xff]  }
  0x2c   :  { %413 = vmatprep.subr.bf16.mxu1 %v1180_v53  ;;  %v1286_v53 = vld [vmem:[%s1741_s7 + $0xa4] ss:$8 sps:$4 sm:$0xff]  }
  0x2e   :  { %700 = vmatpush1.bf16.msra.mxu0 %v1212_v63 }
  0x2f   :  { %414 = vmatpush1.bf16.msra.mxu1 %v1182_v55  ;;  %701 = vmatprep.subr.bf16.mxu0 %v1217_v1  ;;  %v1289_v55 = vld [vmem:[%s1741_s7 + $0xb4] ss:$8 sps:$4 sm:$0xff]  }
  0x30   :  { %415 = vmatprep.subr.bf16.mxu1 %v1186_v58  ;;  %v1290_v58 = vld [vmem:[%s1741_s7 + $0xc0] ss:$8 sps:$4 sm:$0xff]  }
  0x32   :  { %702 = vmatpush1.bf16.msra.mxu0 %v1215_v3 }
  0x33   :  { %416 = vmatpush1.bf16.msra.mxu1 %v1188_v60  ;;  %703 = vmatprep.subr.bf16.mxu0 %v1220_v5  ;;  %v1293_v60 = vld [vmem:[%s1741_s7 + $0xd0] ss:$8 sps:$4 sm:$0xff]   ;;  %v475_v5 = vlaneseq }
  0x34   :  { %417 = vmatprep.subr.bf16.mxu1 %v1192_v62 }
  0x36   :  { %704 = vmatpush1.bf16.msra.mxu0 %v1218_v7 }
  0x37   :  { %418 = vmatpush1.bf16.msra.mxu1 %v1194_v0  ;;  %705 = vmatprep.subr.bf16.mxu0 %v1223_v10 }
  0x38   :  { %419 = vmatprep.subr.bf16.mxu1 %v1198_v2 }
  0x3a   :  { %706 = vmatpush1.bf16.msra.mxu0 %v1221_v12 }
  0x3b   :  { %420 = vmatpush1.bf16.msra.mxu1 %v1200_v4  ;;  %707 = vmatprep.subr.bf16.mxu0 %v1226_v13 }
  0x3c   :  { %421 = vmatprep.subr.bf16.mxu1 %v1203_v6  ;;  %v476_v6 = vshrl.u32 %v475_v5, 7 }
  0x3e   :  { %708 = vmatpush1.bf16.msra.mxu0 %v1224_v14  ;;  %v1694_v7 = vsub.s32 0, %v476_v6  ;;  %v1699_v9 = vsub.s32 1, %v476_v6 }
  0x3f   :  { %422 = vmatpush1.bf16.msra.mxu1 %v1205_v8  ;;  %709 = vmatprep.subr.bf16.mxu0 %v1229_v16  ;;  %v473_v8 = vld [vmem:[%s1742_s4] sm:$0x3] }
  0x40   :  { %944 = vmatprep.subr.bf16.mxu1 %v1256_v34  ;;  %v478_v12 = vrot.slane %v473_v8, %v1694_v7 }
  0x42   :  { %424 = vmatmul.mubr.bf16.vlgmr.msra.gmra.mrb[0].mxu1 %v44_v11  ;;  %710 = vmatpush1.bf16.msra.mxu0 %v1227_v15  ;;  %v482_v15 = vrot.slane %v473_v8, %v1699_v9 }
  0x43   :  { %711 = vmatprep.subr.bf16.mxu0 %v1232_v17  ;;  %945 = vmatpush1.bf16.msra.mxu1 %v1254_v33 }
  0x44   :  { %946 = vmatprep.subr.bf16.mxu1 %v1259_v35 }
  0x46   :  { %712 = vmatpush1.bf16.msra.mxu0 %v1230_v18 }
  0x47   :  { %713 = vmatprep.subr.bf16.mxu0 %v1235_v19  ;;  %947 = vmatpush1.bf16.msra.mxu1 %v1257_v36 }
  0x48   :  { %948 = vmatprep.subr.bf16.mxu1 %v1262_v37 }
  0x4a   :  { %714 = vmatpush1.bf16.msra.mxu0 %v1233_v20 }
  0x4b   :  { %715 = vmatprep.subr.bf16.mxu0 %v1238_v21  ;;  %949 = vmatpush1.bf16.msra.mxu1 %v1260_v38 }
  0x4c   :  { %950 = vmatprep.subr.bf16.mxu1 %v1265_v39 }
  0x4e   :  { %716 = vmatpush1.bf16.msra.mxu0 %v1236_v22 }
  0x4f   :  { %717 = vmatprep.subr.bf16.mxu0 %v1241_v23  ;;  %951 = vmatpush1.bf16.msra.mxu1 %v1263_v40 }
  0x50   :  { %952 = vmatprep.subr.bf16.mxu1 %v1268_v41 }
  0x52   :  { %718 = vmatpush1.bf16.msra.mxu0 %v1239_v24 }
  0x53   :  { %719 = vmatprep.subr.bf16.mxu0 %v1244_v25  ;;  %953 = vmatpush1.bf16.msra.mxu1 %v1266_v42 }
  0x54   :  { %954 = vmatprep.subr.bf16.mxu1 %v1271_v43  ;;  %v16_v43 = vstv %s1744_s10 }
  0x55   :  { %17 = vst [vmem:[#allocation2] sm:$0x1] %v16_v43 }
  0x56   :  { %720 = vmatpush1.bf16.msra.mxu0 %v1242_v26  ;;  %v1298_v26 = vld [vmem:[%s1741_s7 + $0xe4] ss:$8 sps:$4 sm:$0xff]  }
  0x57   :  { %721 = vmatprep.subr.bf16.mxu0 %v1247_v27  ;;  %955 = vmatpush1.bf16.msra.mxu1 %v1269_v44  ;;  %v1296_v27 = vld [vmem:[%s1741_s7 + $0xe0] ss:$8 sps:$4 sm:$0xff]  }
  0x58   :  { %956 = vmatprep.subr.bf16.mxu1 %v1274_v45  ;;  %v772_v44 = vld [vmem:[%s1745_s8] sm:$0x3] }
  0x59   :  { %v777_v45 = vrot.slane %v772_v44, %v1694_v7 }
  0x5a   :  { %722 = vmatpush1.bf16.msra.mxu0 %v1245_v28  ;;  %v1301_v28 = vld [vmem:[%s1741_s7 + $0xf4] ss:$8 sps:$4 sm:$0xff]  }
  0x5b   :  { %723 = vmatprep.subr.bf16.mxu0 %v1250_v29  ;;  %957 = vmatpush1.bf16.msra.mxu1 %v1272_v46  ;;  %v1299_v29 = vld [vmem:[%s1741_s7 + $0xf0] ss:$8 sps:$4 sm:$0xff]   ;;  %v781_v46 = vrot.slane %v772_v44, %v1699_v9 }
  0x5c   :  { %958 = vmatprep.subr.bf16.mxu1 %v1277_v47  ;;  %v987_v47 = vld [vmem:[%s1746_s9] sm:$0x3] }
  0x5e   :  { %724 = vmatpush1.bf16.msra.mxu0 %v1248_v30  ;;  %v523_v30 = vld [vmem:[%s1743_s6] sm:$0x3] }
  0x5f   :  { %725 = vmatprep.subr.bf16.mxu0 %v1253_v31  ;;  %959 = vmatpush1.bf16.msra.mxu1 %v1275_v48  ;;  %v528_v31 = vrot.slane %v523_v30, %v1694_v7 }
  0x60   :  { %960 = vmatprep.subr.bf16.mxu1 %v1280_v49 }
  0x62   :  { %726 = vmatpush1.bf16.msra.mxu0 %v1251_v32  ;;  %v532_v32 = vrot.slane %v523_v30, %v1699_v9 }
  0x63   :  { %961 = vmatpush1.bf16.msra.mxu1 %v1278_v50 }
  0x64   :  { %962 = vmatprep.subr.bf16.mxu1 %v1283_v51  ;;  %v992_v51 = vrot.slane %v987_v47, %v1694_v7 }
  0x67   :  { %963 = vmatpush1.bf16.msra.mxu1 %v1281_v52 }
  0x68   :  { %964 = vmatprep.subr.bf16.mxu1 %v1286_v53 }
  0x6b   :  { %965 = vmatpush1.bf16.msra.mxu1 %v1284_v54  ;;  %v996_v54 = vrot.slane %v987_v47, %v1699_v9 }
  0x6c   :  { %966 = vmatprep.subr.bf16.mxu1 %v1289_v55 }
  0x6f   :  { %967 = vmatpush1.bf16.msra.mxu1 %v1287_v56 }
  0x70   :  { %968 = vmatprep.subr.bf16.mxu1 %v1292_v57 }
  0x73   :  { %969 = vmatpush1.bf16.msra.mxu1 %v1290_v58 }
  0x74   :  { %970 = vmatprep.subr.bf16.mxu1 %v1295_v59 }
  0x77   :  { %971 = vmatpush1.bf16.msra.mxu1 %v1293_v60 }
  0x78   :  { %972 = vmatprep.subr.bf16.mxu1 %v1298_v26 }
  0x7b   :  { %973 = vmatpush1.bf16.msra.mxu1 %v1296_v27 }
  0x7c   :  { %974 = vmatprep.subr.bf16.mxu1 %v1301_v28 }
  0x7f   :  { %975 = vmatpush1.bf16.msra.mxu1 %v1299_v29 }
  0xe0   :  { %v155_v61 = vpop.f32.mrb[0].mxu0 }
  0xe1   :  { %v157_v62 = vpop.f32.mrb[1].mxu0 }
  0xe2   :  { %v159_v63 = vpop.f32.mrb[2].mxu0 }
  0xe3   :  { %v160_v0 = vpop.f32.mrb[3].mxu0 }
  0xf8   :  { %v466_v1 = vpop.f32.mrb[4].mxu0 }
  0xf9   :  { %v468_v2 = vpop.f32.mrb[5].mxu0 }
  0xfa   :  { %v470_v3 = vpop.f32.mrb[6].mxu0 }
  0xfb   :  { %v471_v4 = vpop.f32.mrb[7].mxu0 }
 0x115   :  { %v425_v10 = vpop.f32.mrb[0].mxu1 }
 0x116   :  { %v426_v11 = vadd.f32 %v425_v10, %v155_v61  ;;  %v427_v13 = vpop.f32.mrb[1].mxu1  ;;  %v1133_v61 = vld [vmem:[#allocation2] ss:$0 sm:$0xff] }
 0x117   :  { %v428_v14 = vadd.f32 %v427_v13, %v157_v62  ;;  %v429_v16 = vpop.f32.mrb[2].mxu1 }
 0x118   :  { %v467_v17 = vadd.f32 %v466_v1, %v426_v11  ;;  %v430_v18 = vpop.f32.mrb[3].mxu1 }
 0x119   :  { %v469_v19 = vadd.f32 %v468_v2, %v428_v14 }
 0x11a   :  { %v485_v20 = vadd.f32 %v478_v12, %v467_v17 }
 0x11b   :  { %v486_v21 = vadd.f32 %v482_v15, %v469_v19 }
 0x11c   :  { %v487_v22 = vmax.f32 %v485_v20, 0.0 }
 0x11d   :  { %v488_v23 = vmax.f32 %v486_v21, 0.0 }
 0x11e   :  { %v489_v25 = vpack.c.bf16 %v487_v22, %v487_v22 }
 0x11f   :  { %v490_v24 = vpack.c.bf16 %v488_v23, %v488_v23 }
 0x121   :  { %727 = vmatprep.mubr.bf16.mxu0 %v490_v24 }
 0x122   :  { %728 = vmatmul.mubr.bf16.vlgmr.msra.gmra.mrb[8].mxu0 %v489_v25 }
 0x1f5   :  { %v729_v33 = vpop.f32.mrb[8].mxu0 }
 0x1f6   :  { %v730_v34 = vadd.f32 %v729_v33, %v528_v31  ;;  %v731_v35 = vpop.f32.mrb[9].mxu0 }
 0x1f7   :  { %v732_v36 = vadd.f32 %v731_v35, %v532_v32  ;;  %v733_v37 = vpop.f32.mrb[10].mxu0 }
 0x1f8   :  { %v736_v38 = vmax.f32 %v730_v34, 0.0  ;;  %v734_v39 = vpop.f32.mrb[11].mxu0 }
 0x1f9   :  { %v737_v40 = vmax.f32 %v732_v36, 0.0 }
 0x1fa   :  { %v738_v42 = vpack.c.bf16 %v736_v38, %v736_v38 }
 0x1fb   :  { %v739_v41 = vpack.c.bf16 %v737_v40, %v737_v40 }
 0x1fd   :  { %976 = vmatprep.mubr.bf16.mxu1 %v739_v41 }
 0x1fe   :  { %977 = vmatmul.mubr.bf16.vlgmr.msra.gmra.mrb[4].mxu1 %v738_v42 }
 0x2d1   :  { %v978_v48 = vpop.f32.mrb[4].mxu1 }
 0x2d2   :  { %v979_v49 = vadd.f32 %v978_v48, %v777_v45  ;;  %v980_v50 = vpop.f32.mrb[5].mxu1 }
 0x2d3   :  { %v981_v52 = vadd.f32 %v980_v50, %v781_v46  ;;  %v982_v53 = vpop.f32.mrb[6].mxu1 }
 0x2d4   :  { %v985_v55 = vmax.f32 %v979_v49, 0.0  ;;  %v983_v56 = vpop.f32.mrb[7].mxu1 }
 0x2d5   :  { %v986_v57 = vmax.f32 %v981_v52, 0.0 }
 0x2d6   :  { %v999_v58 = vmul.f32 %v992_v51, %v985_v55 }
 0x2d7   :  { %v1000_v59 = vmul.f32 %v996_v54, %v986_v57 }
 0x2d9   :  { %v1001_v60 = vadd.f32 %v1000_v59, %v999_v58 }
 0x2db   :  { %1002 = vadd.xlane.f32.xlu0 %v1001_v60 }
 0x368   :  { %v1003_v62 = vpop.xlane.xlu0 %1002 }
 0x369   :  { %v1011_v63 = vadd.f32 %v1133_v61, %v1003_v62 }
 0x36b   :  { %1013 = vst.msk [vmem:[%s1747_s11] sm:$0xff] %vm1012_vm5, %v1011_v63 }

</bundles_post_ra>
